<compile_context>
chip_gen: v6e
topology: v6e:2x2x1
jax: 0.10.0
libtpu: 0.0.40
codegen_flags: <defaults>
</compile_context>

<pallas_src>
import functools
import math

import jax
import jax.numpy as jnp
from jax.experimental import pallas as pl
from jax.experimental.pallas import tpu as pltpu


_GELU_C = math.sqrt(2.0 / math.pi)


# ----------------------------- in-kernel helpers -----------------------------

def _matmul_bias(x, w, b):
    """bf16 MXU matmul with f32 accumulation + f32 bias."""
    y = jnp.dot(x.astype(w.dtype), w, preferred_element_type=jnp.float32)
    return y + b


def _layernorm(x, g, b, eps):
    mu = jnp.mean(x, axis=-1, keepdims=True)
    xc = x - mu
    var = jnp.mean(xc * xc, axis=-1, keepdims=True)
    return xc * jax.lax.rsqrt(var + eps) * g + b


def _gelu(y):
    # tanh-approx GELU (BERT intermediate activation), f32 on the VPU/EUP.
    return 0.5 * y * (1.0 + jnp.tanh(_GELU_C * (y + 0.044715 * y * y * y)))


# ----------------------------- fused kernel -----------------------------

def _simcse_kernel(emb_ref, bias_ref, eg_ref, eb_ref,
                   wqkv_ref, bqkv_ref, wo_ref, bo_ref,
                   ln1g_ref, ln1b_ref, w1_ref, b1_ref,
                   w2_ref, b2_ref, ln2g_ref, ln2b_ref,
                   mlpw_ref, mlpb_ref,
                   pool_ref, mlp_ref,
                   x_scr, *, num_heads, eps):
    """One grid step = one (batch element, encoder layer).

    The hidden state for the current batch element lives in x_scr (VMEM) and
    is carried across the layer axis of the grid.
    """
    l = pl.program_id(1)
    n_layers = pl.num_programs(1)

    S, H = x_scr.shape
    dH = H // num_heads
    scale = 1.0 / math.sqrt(dH)

    # ---- layer 0: embedding LayerNorm into the resident VMEM slab ----
    @pl.when(l == 0)
    def _():
        x_scr[...] = _layernorm(emb_ref[0], eg_ref[...], eb_ref[...], eps)

    x = x_scr[...]                                   # (S, H) f32

    # ---- self-attention: fused QKV projection (lane-dense N = 3H) ----
    qkv = _matmul_bias(x, wqkv_ref[0], bqkv_ref[0])  # (S, 3H) f32
    bias = bias_ref[0]                               # (1, S) additive key mask
    wo = wo_ref[0]                                   # (H, H) bf16

    # Per-head attention, unrolled (num_heads is tiny and static); the output
    # projection is accumulated per head, so no concat/transpose is needed.
    attn = jnp.zeros((S, H), jnp.float32)
    for h in range(num_heads):
        qh = qkv[:, h * dH:(h + 1) * dH]
        kh = qkv[:, H + h * dH:H + (h + 1) * dH]
        vh = qkv[:, 2 * H + h * dH:2 * H + (h + 1) * dH]
        s = jax.lax.dot_general(
            qh.astype(wo.dtype), kh.astype(wo.dtype),
            (((1,), (1,)), ((), ())),
            preferred_element_type=jnp.float32) * scale           # (S, S)
        s = s + bias
        s = s - jnp.max(s, axis=-1, keepdims=True)
        p = jnp.exp(s)
        p = p * pl.reciprocal(jnp.sum(p, axis=-1, keepdims=True), approx=True)
        ctx_h = jnp.dot(p.astype(wo.dtype), vh.astype(wo.dtype),
                        preferred_element_type=jnp.float32)       # (S, dH)
        attn = attn + jnp.dot(ctx_h.astype(wo.dtype),
                              wo[h * dH:(h + 1) * dH, :],
                              preferred_element_type=jnp.float32)
    attn_out = attn + bo_ref[0]

    # residual add fused into LayerNorm
    x = _layernorm(x + attn_out, ln1g_ref[0], ln1b_ref[0], eps)

    # ---- feed-forward ----
    hmid = _gelu(_matmul_bias(x, w1_ref[0], b1_ref[0]))
    ffn_out = _matmul_bias(hmid, w2_ref[0], b2_ref[0])
    x = _layernorm(x + ffn_out, ln2g_ref[0], ln2b_ref[0], eps)

    x_scr[...] = x

    # ---- epilogue on the last layer: Pooler('cls') + MLP(tanh) head ----
    @pl.when(l == n_layers - 1)
    def _():
        pool = x[0:1, :]                             # CLS token, (1, H)
        pool_ref[0] = pool
        mlp_ref[0] = jnp.tanh(_matmul_bias(pool, mlpw_ref[...], mlpb_ref[...]))


# ----------------------------- parameters -----------------------------

def init_params(key, vocab=100, H=32, inter=64, n_layers=2,
                max_pos=64, type_vocab=2):
    keys = iter(jax.random.split(key, 16))

    def w(shape):
        return jax.random.normal(next(keys), shape, jnp.float32) * 0.02

    def wl(shape):  # per-layer stacked matmul weight, stored bf16 for the MXU
        return w((n_layers,) + shape).astype(jnp.bfloat16)

    params = {
        "word_emb": w((vocab, H)),
        "pos_emb": w((max_pos, H)),
        "type_emb": w((type_vocab, H)),
        "emb_ln_g": jnp.ones((1, H), jnp.float32),
        "emb_ln_b": jnp.zeros((1, H), jnp.float32),
        # fused QKV: wq|wk|wv concatenated on the output dim (lane-dense N=3H)
        "wqkv": wl((H, 3 * H)),
        "bqkv": jnp.zeros((n_layers, 1, 3 * H), jnp.float32),
        "wo": wl((H, H)),
        "bo": jnp.zeros((n_layers, 1, H), jnp.float32),
        "ln1_g": jnp.ones((n_layers, 1, H), jnp.float32),
        "ln1_b": jnp.zeros((n_layers, 1, H), jnp.float32),
        "w1": wl((H, inter)),
        "b1": jnp.zeros((n_layers, 1, inter), jnp.float32),
        "w2": wl((inter, H)),
        "b2": jnp.zeros((n_layers, 1, H), jnp.float32),
        "ln2_g": jnp.ones((n_layers, 1, H), jnp.float32),
        "ln2_b": jnp.zeros((n_layers, 1, H), jnp.float32),
        # MLP head: nn.Linear(hidden, hidden) + Tanh
        "mlp_w": w((H, H)).astype(jnp.bfloat16),
        "mlp_b": jnp.zeros((1, H), jnp.float32),
    }
    return params


# ----------------------------- forward pass -----------------------------

def simcse_forward(params, input_ids, attention_mask, token_type_ids,
                   num_heads=2):
    B, S = input_ids.shape
    H = params["word_emb"].shape[1]
    L = params["wqkv"].shape[0]
    inter = params["w1"].shape[2]

    # TODO(synk): embedding-table gathers stay in XLA (no clean small-Pallas
    # gather); note pos_emb[:S] assumes S <= max_pos.  Dropout = identity (eval).
    emb = (params["word_emb"][input_ids]
           + params["pos_emb"][:S][None, :, :]
           + params["type_emb"][token_type_ids]).astype(jnp.float32)

    # mask bias precomputed once (hoisted out of the kernel), additive over keys
    bias = ((1.0 - attention_mask.astype(jnp.float32)) * -1e9).reshape(B, 1, S)

    in_specs = [
        pl.BlockSpec((1, S, H), lambda b, l: (b, 0, 0)),      # emb
        pl.BlockSpec((1, 1, S), lambda b, l: (b, 0, 0)),      # mask bias
        pl.BlockSpec((1, H), lambda b, l: (0, 0)),            # emb_ln_g
        pl.BlockSpec((1, H), lambda b, l: (0, 0)),            # emb_ln_b
        pl.BlockSpec((1, H, 3 * H), lambda b, l: (l, 0, 0)),  # wqkv
        pl.BlockSpec((1, 1, 3 * H), lambda b, l: (l, 0, 0)),  # bqkv
        pl.BlockSpec((1, H, H), lambda b, l: (l, 0, 0)),      # wo
        pl.BlockSpec((1, 1, H), lambda b, l: (l, 0, 0)),      # bo
        pl.BlockSpec((1, 1, H), lambda b, l: (l, 0, 0)),      # ln1_g
        pl.BlockSpec((1, 1, H), lambda b, l: (l, 0, 0)),      # ln1_b
        pl.BlockSpec((1, H, inter), lambda b, l: (l, 0, 0)),  # w1
        pl.BlockSpec((1, 1, inter), lambda b, l: (l, 0, 0)),  # b1
        pl.BlockSpec((1, inter, H), lambda b, l: (l, 0, 0)),  # w2
        pl.BlockSpec((1, 1, H), lambda b, l: (l, 0, 0)),      # b2
        pl.BlockSpec((1, 1, H), lambda b, l: (l, 0, 0)),      # ln2_g
        pl.BlockSpec((1, 1, H), lambda b, l: (l, 0, 0)),      # ln2_b
        pl.BlockSpec((H, H), lambda b, l: (0, 0)),            # mlp_w
        pl.BlockSpec((1, H), lambda b, l: (0, 0)),            # mlp_b
    ]
    out_specs = (
        pl.BlockSpec((1, 1, H), lambda b, l: (b, 0, 0)),      # pool_out
        pl.BlockSpec((1, 1, H), lambda b, l: (b, 0, 0)),      # mlp_out
    )

    pool3, mlp3 = pl.pallas_call(
        functools.partial(_simcse_kernel, num_heads=num_heads, eps=1e-12),
        out_shape=(jax.ShapeDtypeStruct((B, 1, H), jnp.float32),
                   jax.ShapeDtypeStruct((B, 1, H), jnp.float32)),
        grid=(B, L),
        in_specs=in_specs,
        out_specs=out_specs,
        scratch_shapes=[pltpu.VMEM((S, H), jnp.float32)],
        compiler_params=pltpu.CompilerParams(
            dimension_semantics=("parallel", "arbitrary")),
    )(emb, bias, params["emb_ln_g"], params["emb_ln_b"],
      params["wqkv"], params["bqkv"], params["wo"], params["bo"],
      params["ln1_g"], params["ln1_b"], params["w1"], params["b1"],
      params["w2"], params["b2"], params["ln2_g"], params["ln2_b"],
      params["mlp_w"], params["mlp_b"])

    return pool3.reshape(B, H), mlp3.reshape(B, H)


# ----------------------------- main -----------------------------

if __name__ == "__main__":
    key = jax.random.PRNGKey(0)
    k_param, k_ids = jax.random.split(key)

    B, S, H = 2, 8, 32
    params = init_params(k_param, vocab=100, H=H, inter=64, n_layers=2)

    input_ids = jax.random.randint(k_ids, (B, S), 0, 100, dtype=jnp.int32)
    attention_mask = jnp.ones((B, S), jnp.float32).at[1, 6:].set(0.0)
    token_type_ids = jnp.zeros((B, S), jnp.int32)

    pool_out, mlp_out = jax.jit(
        functools.partial(simcse_forward, num_heads=2)
    )(params, input_ids, attention_mask, token_type_ids)

    jax.block_until_ready((pool_out, mlp_out))
    assert pool_out.shape == (B, H) and mlp_out.shape == (B, H)
    print("KERNEL_OK")
</pallas_src>

<mosaic_0001>
module attributes {stable_mosaic.version = 11 : i64} {
  func.func @_simcse_kernel(%arg0: i32, %arg1: i32, %arg2: memref<1x8x32xf32, #tpu.memory_space<vmem>>, %arg3: memref<1x1x8xf32, #tpu.memory_space<vmem>>, %arg4: memref<1x32xf32, #tpu.memory_space<vmem>>, %arg5: memref<1x32xf32, #tpu.memory_space<vmem>>, %arg6: memref<1x32x96xbf16, #tpu.memory_space<vmem>>, %arg7: memref<1x1x96xf32, #tpu.memory_space<vmem>>, %arg8: memref<1x32x32xbf16, #tpu.memory_space<vmem>>, %arg9: memref<1x1x32xf32, #tpu.memory_space<vmem>>, %arg10: memref<1x1x32xf32, #tpu.memory_space<vmem>>, %arg11: memref<1x1x32xf32, #tpu.memory_space<vmem>>, %arg12: memref<1x32x64xbf16, #tpu.memory_space<vmem>>, %arg13: memref<1x1x64xf32, #tpu.memory_space<vmem>>, %arg14: memref<1x64x32xbf16, #tpu.memory_space<vmem>>, %arg15: memref<1x1x32xf32, #tpu.memory_space<vmem>>, %arg16: memref<1x1x32xf32, #tpu.memory_space<vmem>>, %arg17: memref<1x1x32xf32, #tpu.memory_space<vmem>>, %arg18: memref<32x32xbf16, #tpu.memory_space<vmem>>, %arg19: memref<1x32xf32, #tpu.memory_space<vmem>>, %arg20: memref<1x1x32xf32, #tpu.memory_space<vmem>>, %arg21: memref<1x1x32xf32, #tpu.memory_space<vmem>>, %arg22: memref<8x32xf32, #tpu.memory_space<vmem>>) attributes {dimension_semantics = [#tpu.dimension_semantics<parallel>, #tpu.dimension_semantics<arbitrary>], iteration_bounds = array<i64: 2, 2>, scalar_prefetch = 0 : i64, scratch_operands = 1 : i64, tpu.core_type = #tpu.core_type<tc>, window_params = [{transform_indices = @transform_0, window_bounds = array<i64: 1, 8, 32>}, {transform_indices = @transform_1, window_bounds = array<i64: 1, 1, 8>}, {pipeline_mode = #tpu.pipeline_mode<synchronous>, transform_indices = @transform_2, window_bounds = array<i64: 1, 32>}, {pipeline_mode = #tpu.pipeline_mode<synchronous>, transform_indices = @transform_3, window_bounds = array<i64: 1, 32>}, {transform_indices = @transform_4, window_bounds = array<i64: 1, 32, 96>}, {transform_indices = @transform_5, window_bounds = array<i64: 1, 1, 96>}, {transform_indices = @transform_6, window_bounds = array<i64: 1, 32, 32>}, {transform_indices = @transform_7, window_bounds = array<i64: 1, 1, 32>}, {transform_indices = @transform_8, window_bounds = array<i64: 1, 1, 32>}, {transform_indices = @transform_9, window_bounds = array<i64: 1, 1, 32>}, {transform_indices = @transform_10, window_bounds = array<i64: 1, 32, 64>}, {transform_indices = @transform_11, window_bounds = array<i64: 1, 1, 64>}, {transform_indices = @transform_12, window_bounds = array<i64: 1, 64, 32>}, {transform_indices = @transform_13, window_bounds = array<i64: 1, 1, 32>}, {transform_indices = @transform_14, window_bounds = array<i64: 1, 1, 32>}, {transform_indices = @transform_15, window_bounds = array<i64: 1, 1, 32>}, {pipeline_mode = #tpu.pipeline_mode<synchronous>, transform_indices = @transform_16, window_bounds = array<i64: 32, 32>}, {pipeline_mode = #tpu.pipeline_mode<synchronous>, transform_indices = @transform_17, window_bounds = array<i64: 1, 32>}, {transform_indices = @transform_18, window_bounds = array<i64: 1, 1, 32>}, {transform_indices = @transform_19, window_bounds = array<i64: 1, 1, 32>}]} {
    %c0_i32 = arith.constant 0 : i32
    %0 = arith.cmpi eq, %arg1, %c0_i32 : i32
    %1 = arith.extui %0 : i1 to i32
    %c0_i32_0 = arith.constant 0 : i32
    %2 = arith.cmpi ne, %1, %c0_i32_0 : i32
    scf.if %2 {
      %c0_73 = arith.constant 0 : index
      %c0_74 = arith.constant 0 : index
      %c0_75 = arith.constant 0 : index
      %158 = vector.load %arg2[%c0_73, %c0_74, %c0_75] : memref<1x8x32xf32, #tpu.memory_space<vmem>>, vector<1x8x32xf32>
      %159 = vector.shape_cast %158 : vector<1x8x32xf32> to vector<8x32xf32>
      %c0_76 = arith.constant 0 : index
      %c0_77 = arith.constant 0 : index
      %160 = vector.load %arg4[%c0_76, %c0_77] : memref<1x32xf32, #tpu.memory_space<vmem>>, vector<1x32xf32>
      %c0_78 = arith.constant 0 : index
      %c0_79 = arith.constant 0 : index
      %161 = vector.load %arg5[%c0_78, %c0_79] : memref<1x32xf32, #tpu.memory_space<vmem>>, vector<1x32xf32>
      %cst_80 = arith.constant dense<0.000000e+00> : vector<8xf32>
      %162 = vector.multi_reduction <add>, %159, %cst_80 [1] : vector<8x32xf32> to vector<8xf32>
      %163 = vector.shape_cast %162 : vector<8xf32> to vector<8x1xf32>
      %cst_81 = arith.constant 3.200000e+01 : f32
      %164 = vector.broadcast %cst_81 : f32 to vector<8x1xf32>
      %165 = arith.divf %163, %164 : vector<8x1xf32>
      %166 = vector.broadcast %165 : vector<8x1xf32> to vector<8x32xf32>
      %167 = arith.subf %159, %166 : vector<8x32xf32>
      %168 = arith.mulf %167, %167 : vector<8x32xf32>
      %cst_82 = arith.constant dense<0.000000e+00> : vector<8xf32>
      %169 = vector.multi_reduction <add>, %168, %cst_82 [1] : vector<8x32xf32> to vector<8xf32>
      %170 = vector.shape_cast %169 : vector<8xf32> to vector<8x1xf32>
      %cst_83 = arith.constant 3.200000e+01 : f32
      %171 = vector.broadcast %cst_83 : f32 to vector<8x1xf32>
      %172 = arith.divf %170, %171 : vector<8x1xf32>
      %cst_84 = arith.constant 9.99999996E-13 : f32
      %173 = vector.broadcast %cst_84 : f32 to vector<8x1xf32>
      %174 = arith.addf %172, %173 : vector<8x1xf32>
      %175 = math.rsqrt %174 : vector<8x1xf32>
      %176 = vector.broadcast %175 : vector<8x1xf32> to vector<8x32xf32>
      %177 = arith.mulf %167, %176 : vector<8x32xf32>
      %178 = vector.broadcast %160 : vector<1x32xf32> to vector<8x32xf32>
      %179 = arith.mulf %177, %178 : vector<8x32xf32>
      %180 = vector.broadcast %161 : vector<1x32xf32> to vector<8x32xf32>
      %181 = arith.addf %179, %180 : vector<8x32xf32>
      %c0_85 = arith.constant 0 : index
      %c0_86 = arith.constant 0 : index
      %182 = vector.load %arg22[%c0_85, %c0_86] : memref<8x32xf32, #tpu.memory_space<vmem>>, vector<8x32xf32>
      tpu.vector_store %arg22[%c0_85, %c0_86], %181 {strides = array<i32>} : memref<8x32xf32, #tpu.memory_space<vmem>>, vector<8x32xf32>,
    } else {
    }
    %c0 = arith.constant 0 : index
    %c0_1 = arith.constant 0 : index
    %3 = vector.load %arg22[%c0, %c0_1] : memref<8x32xf32, #tpu.memory_space<vmem>>, vector<8x32xf32>
    %c0_2 = arith.constant 0 : index
    %c0_3 = arith.constant 0 : index
    %c0_4 = arith.constant 0 : index
    %4 = vector.load %arg6[%c0_2, %c0_3, %c0_4] : memref<1x32x96xbf16, #tpu.memory_space<vmem>>, vector<1x32x96xbf16>
    %5 = vector.shape_cast %4 : vector<1x32x96xbf16> to vector<32x96xbf16>
    %c0_5 = arith.constant 0 : index
    %c0_6 = arith.constant 0 : index
    %c0_7 = arith.constant 0 : index
    %6 = vector.load %arg7[%c0_5, %c0_6, %c0_7] : memref<1x1x96xf32, #tpu.memory_space<vmem>>, vector<1x1x96xf32>
    %7 = vector.shape_cast %6 : vector<1x1x96xf32> to vector<1x96xf32>
    %8 = arith.truncf %3 : vector<8x32xf32> to vector<8x32xbf16>
    %cst = arith.constant dense<0.000000e+00> : vector<8x96xf32>
    %9 = tpu.matmul %8, %5, %cst {dimension_numbers = #tpu.dot_dimension_numbers<[1], [0], [0], [1], [0, 0, 1, 1], [], []>} : vector<8x32xbf16>, vector<32x96xbf16>, vector<8x96xf32> -> vector<8x96xf32>
    %10 = vector.broadcast %7 : vector<1x96xf32> to vector<8x96xf32>
    %11 = arith.addf %9, %10 : vector<8x96xf32>
    %c0_8 = arith.constant 0 : index
    %c0_9 = arith.constant 0 : index
    %c0_10 = arith.constant 0 : index
    %12 = vector.load %arg3[%c0_8, %c0_9, %c0_10] : memref<1x1x8xf32, #tpu.memory_space<vmem>>, vector<1x1x8xf32>
    %13 = vector.shape_cast %12 : vector<1x1x8xf32> to vector<1x8xf32>
    %c0_11 = arith.constant 0 : index
    %c0_12 = arith.constant 0 : index
    %c0_13 = arith.constant 0 : index
    %14 = vector.load %arg8[%c0_11, %c0_12, %c0_13] : memref<1x32x32xbf16, #tpu.memory_space<vmem>>, vector<1x32x32xbf16>
    %15 = vector.shape_cast %14 : vector<1x32x32xbf16> to vector<32x32xbf16>
    %cst_14 = arith.constant 0.000000e+00 : f32
    %16 = vector.broadcast %cst_14 : f32 to vector<8x32xf32>
    %17 = vector.extract_strided_slice %11 {offsets = [0, 0], sizes = [8, 16], strides = [1, 1]} : vector<8x96xf32> to vector<8x16xf32>
    %18 = vector.extract_strided_slice %11 {offsets = [0, 32], sizes = [8, 16], strides = [1, 1]} : vector<8x96xf32> to vector<8x16xf32>
    %19 = vector.extract_strided_slice %11 {offsets = [0, 64], sizes = [8, 16], strides = [1, 1]} : vector<8x96xf32> to vector<8x16xf32>
    %20 = arith.truncf %17 : vector<8x16xf32> to vector<8x16xbf16>
    %21 = arith.truncf %18 : vector<8x16xf32> to vector<8x16xbf16>
    %cst_15 = arith.constant dense<0.000000e+00> : vector<8x8xf32>
    %22 = tpu.matmul %20, %21, %cst_15 {dimension_numbers = #tpu.dot_dimension_numbers<[1], [1], [0], [0], [0, 0, 1, 0], [], []>} : vector<8x16xbf16>, vector<8x16xbf16>, vector<8x8xf32> -> vector<8x8xf32>
    %cst_16 = arith.constant 2.500000e-01 : f32
    %23 = vector.broadcast %cst_16 : f32 to vector<8x8xf32>
    %24 = arith.mulf %22, %23 : vector<8x8xf32>
    %25 = vector.broadcast %13 : vector<1x8xf32> to vector<8x8xf32>
    %26 = arith.addf %24, %25 : vector<8x8xf32>
    %cst_17 = arith.constant dense<0xFF800000> : vector<8xf32>
    %27 = vector.multi_reduction <maximumf>, %26, %cst_17 [1] : vector<8x8xf32> to vector<8xf32>
    %28 = vector.shape_cast %27 : vector<8xf32> to vector<8x1xf32>
    %29 = vector.broadcast %28 : vector<8x1xf32> to vector<8x8xf32>
    %30 = arith.subf %26, %29 : vector<8x8xf32>
    %31 = math.exp %30 : vector<8x8xf32>
    %cst_18 = arith.constant dense<0.000000e+00> : vector<8xf32>
    %32 = vector.multi_reduction <add>, %31, %cst_18 [1] : vector<8x8xf32> to vector<8xf32>
    %33 = vector.shape_cast %32 : vector<8xf32> to vector<8x1xf32>
    %34 = tpu.reciprocal %33 {approx = true} : vector<8x1xf32> -> vector<8x1xf32>
    %35 = vector.broadcast %34 : vector<8x1xf32> to vector<8x8xf32>
    %36 = arith.mulf %31, %35 : vector<8x8xf32>
    %37 = arith.truncf %36 : vector<8x8xf32> to vector<8x8xbf16>
    %38 = arith.truncf %19 : vector<8x16xf32> to vector<8x16xbf16>
    %cst_19 = arith.constant dense<0.000000e+00> : vector<8x16xf32>
    %39 = tpu.matmul %37, %38, %cst_19 {dimension_numbers = #tpu.dot_dimension_numbers<[1], [0], [0], [1], [0, 0, 1, 1], [], []>} : vector<8x8xbf16>, vector<8x16xbf16>, vector<8x16xf32> -> vector<8x16xf32>
    %40 = arith.truncf %39 : vector<8x16xf32> to vector<8x16xbf16>
    %41 = vector.extract_strided_slice %15 {offsets = [0, 0], sizes = [16, 32], strides = [1, 1]} : vector<32x32xbf16> to vector<16x32xbf16>
    %cst_20 = arith.constant dense<0.000000e+00> : vector<8x32xf32>
    %42 = tpu.matmul %40, %41, %cst_20 {dimension_numbers = #tpu.dot_dimension_numbers<[1], [0], [0], [1], [0, 0, 1, 1], [], []>} : vector<8x16xbf16>, vector<16x32xbf16>, vector<8x32xf32> -> vector<8x32xf32>
    %43 = arith.addf %16, %42 : vector<8x32xf32>
    %44 = vector.extract_strided_slice %11 {offsets = [0, 16], sizes = [8, 16], strides = [1, 1]} : vector<8x96xf32> to vector<8x16xf32>
    %45 = vector.extract_strided_slice %11 {offsets = [0, 48], sizes = [8, 16], strides = [1, 1]} : vector<8x96xf32> to vector<8x16xf32>
    %46 = vector.extract_strided_slice %11 {offsets = [0, 80], sizes = [8, 16], strides = [1, 1]} : vector<8x96xf32> to vector<8x16xf32>
    %47 = arith.truncf %44 : vector<8x16xf32> to vector<8x16xbf16>
    %48 = arith.truncf %45 : vector<8x16xf32> to vector<8x16xbf16>
    %cst_21 = arith.constant dense<0.000000e+00> : vector<8x8xf32>
    %49 = tpu.matmul %47, %48, %cst_21 {dimension_numbers = #tpu.dot_dimension_numbers<[1], [1], [0], [0], [0, 0, 1, 0], [], []>} : vector<8x16xbf16>, vector<8x16xbf16>, vector<8x8xf32> -> vector<8x8xf32>
    %cst_22 = arith.constant 2.500000e-01 : f32
    %50 = vector.broadcast %cst_22 : f32 to vector<8x8xf32>
    %51 = arith.mulf %49, %50 : vector<8x8xf32>
    %52 = vector.broadcast %13 : vector<1x8xf32> to vector<8x8xf32>
    %53 = arith.addf %51, %52 : vector<8x8xf32>
    %cst_23 = arith.constant dense<0xFF800000> : vector<8xf32>
    %54 = vector.multi_reduction <maximumf>, %53, %cst_23 [1] : vector<8x8xf32> to vector<8xf32>
    %55 = vector.shape_cast %54 : vector<8xf32> to vector<8x1xf32>
    %56 = vector.broadcast %55 : vector<8x1xf32> to vector<8x8xf32>
    %57 = arith.subf %53, %56 : vector<8x8xf32>
    %58 = math.exp %57 : vector<8x8xf32>
    %cst_24 = arith.constant dense<0.000000e+00> : vector<8xf32>
    %59 = vector.multi_reduction <add>, %58, %cst_24 [1] : vector<8x8xf32> to vector<8xf32>
    %60 = vector.shape_cast %59 : vector<8xf32> to vector<8x1xf32>
    %61 = tpu.reciprocal %60 {approx = true} : vector<8x1xf32> -> vector<8x1xf32>
    %62 = vector.broadcast %61 : vector<8x1xf32> to vector<8x8xf32>
    %63 = arith.mulf %58, %62 : vector<8x8xf32>
    %64 = arith.truncf %63 : vector<8x8xf32> to vector<8x8xbf16>
    %65 = arith.truncf %46 : vector<8x16xf32> to vector<8x16xbf16>
    %cst_25 = arith.constant dense<0.000000e+00> : vector<8x16xf32>
    %66 = tpu.matmul %64, %65, %cst_25 {dimension_numbers = #tpu.dot_dimension_numbers<[1], [0], [0], [1], [0, 0, 1, 1], [], []>} : vector<8x8xbf16>, vector<8x16xbf16>, vector<8x16xf32> -> vector<8x16xf32>
    %67 = arith.truncf %66 : vector<8x16xf32> to vector<8x16xbf16>
    %68 = vector.extract_strided_slice %15 {offsets = [16, 0], sizes = [16, 32], strides = [1, 1]} : vector<32x32xbf16> to vector<16x32xbf16>
    %cst_26 = arith.constant dense<0.000000e+00> : vector<8x32xf32>
    %69 = tpu.matmul %67, %68, %cst_26 {dimension_numbers = #tpu.dot_dimension_numbers<[1], [0], [0], [1], [0, 0, 1, 1], [], []>} : vector<8x16xbf16>, vector<16x32xbf16>, vector<8x32xf32> -> vector<8x32xf32>
    %70 = arith.addf %43, %69 : vector<8x32xf32>
    %c0_27 = arith.constant 0 : index
    %c0_28 = arith.constant 0 : index
    %c0_29 = arith.constant 0 : index
    %71 = vector.load %arg9[%c0_27, %c0_28, %c0_29] : memref<1x1x32xf32, #tpu.memory_space<vmem>>, vector<1x1x32xf32>
    %72 = vector.shape_cast %71 : vector<1x1x32xf32> to vector<1x32xf32>
    %73 = vector.broadcast %72 : vector<1x32xf32> to vector<8x32xf32>
    %74 = arith.addf %70, %73 : vector<8x32xf32>
    %75 = arith.addf %3, %74 : vector<8x32xf32>
    %c0_30 = arith.constant 0 : index
    %c0_31 = arith.constant 0 : index
    %c0_32 = arith.constant 0 : index
    %76 = vector.load %arg10[%c0_30, %c0_31, %c0_32] : memref<1x1x32xf32, #tpu.memory_space<vmem>>, vector<1x1x32xf32>
    %77 = vector.shape_cast %76 : vector<1x1x32xf32> to vector<1x32xf32>
    %c0_33 = arith.constant 0 : index
    %c0_34 = arith.constant 0 : index
    %c0_35 = arith.constant 0 : index
    %78 = vector.load %arg11[%c0_33, %c0_34, %c0_35] : memref<1x1x32xf32, #tpu.memory_space<vmem>>, vector<1x1x32xf32>
    %79 = vector.shape_cast %78 : vector<1x1x32xf32> to vector<1x32xf32>
    %cst_36 = arith.constant dense<0.000000e+00> : vector<8xf32>
    %80 = vector.multi_reduction <add>, %75, %cst_36 [1] : vector<8x32xf32> to vector<8xf32>
    %81 = vector.shape_cast %80 : vector<8xf32> to vector<8x1xf32>
    %cst_37 = arith.constant 3.200000e+01 : f32
    %82 = vector.broadcast %cst_37 : f32 to vector<8x1xf32>
    %83 = arith.divf %81, %82 : vector<8x1xf32>
    %84 = vector.broadcast %83 : vector<8x1xf32> to vector<8x32xf32>
    %85 = arith.subf %75, %84 : vector<8x32xf32>
    %86 = arith.mulf %85, %85 : vector<8x32xf32>
    %cst_38 = arith.constant dense<0.000000e+00> : vector<8xf32>
    %87 = vector.multi_reduction <add>, %86, %cst_38 [1] : vector<8x32xf32> to vector<8xf32>
    %88 = vector.shape_cast %87 : vector<8xf32> to vector<8x1xf32>
    %cst_39 = arith.constant 3.200000e+01 : f32
    %89 = vector.broadcast %cst_39 : f32 to vector<8x1xf32>
    %90 = arith.divf %88, %89 : vector<8x1xf32>
    %cst_40 = arith.constant 9.99999996E-13 : f32
    %91 = vector.broadcast %cst_40 : f32 to vector<8x1xf32>
    %92 = arith.addf %90, %91 : vector<8x1xf32>
    %93 = math.rsqrt %92 : vector<8x1xf32>
    %94 = vector.broadcast %93 : vector<8x1xf32> to vector<8x32xf32>
    %95 = arith.mulf %85, %94 : vector<8x32xf32>
    %96 = vector.broadcast %77 : vector<1x32xf32> to vector<8x32xf32>
    %97 = arith.mulf %95, %96 : vector<8x32xf32>
    %98 = vector.broadcast %79 : vector<1x32xf32> to vector<8x32xf32>
    %99 = arith.addf %97, %98 : vector<8x32xf32>
    %c0_41 = arith.constant 0 : index
    %c0_42 = arith.constant 0 : index
    %c0_43 = arith.constant 0 : index
    %100 = vector.load %arg12[%c0_41, %c0_42, %c0_43] : memref<1x32x64xbf16, #tpu.memory_space<vmem>>, vector<1x32x64xbf16>
    %101 = vector.shape_cast %100 : vector<1x32x64xbf16> to vector<32x64xbf16>
    %c0_44 = arith.constant 0 : index
    %c0_45 = arith.constant 0 : index
    %c0_46 = arith.constant 0 : index
    %102 = vector.load %arg13[%c0_44, %c0_45, %c0_46] : memref<1x1x64xf32, #tpu.memory_space<vmem>>, vector<1x1x64xf32>
    %103 = vector.shape_cast %102 : vector<1x1x64xf32> to vector<1x64xf32>
    %104 = arith.truncf %99 : vector<8x32xf32> to vector<8x32xbf16>
    %cst_47 = arith.constant dense<0.000000e+00> : vector<8x64xf32>
    %105 = tpu.matmul %104, %101, %cst_47 {dimension_numbers = #tpu.dot_dimension_numbers<[1], [0], [0], [1], [0, 0, 1, 1], [], []>} : vector<8x32xbf16>, vector<32x64xbf16>, vector<8x64xf32> -> vector<8x64xf32>
    %106 = vector.broadcast %103 : vector<1x64xf32> to vector<8x64xf32>
    %107 = arith.addf %105, %106 : vector<8x64xf32>
    %cst_48 = arith.constant 5.000000e-01 : f32
    %108 = vector.broadcast %cst_48 : f32 to vector<8x64xf32>
    %109 = arith.mulf %108, %107 : vector<8x64xf32>
    %cst_49 = arith.constant 4.471500e-02 : f32
    %110 = vector.broadcast %cst_49 : f32 to vector<8x64xf32>
    %111 = arith.mulf %110, %107 : vector<8x64xf32>
    %112 = arith.mulf %111, %107 : vector<8x64xf32>
    %113 = arith.mulf %112, %107 : vector<8x64xf32>
    %114 = arith.addf %107, %113 : vector<8x64xf32>
    %cst_50 = arith.constant 0.797884583 : f32
    %115 = vector.broadcast %cst_50 : f32 to vector<8x64xf32>
    %116 = arith.mulf %115, %114 : vector<8x64xf32>
    %117 = math.tanh %116 : vector<8x64xf32>
    %cst_51 = arith.constant 1.000000e+00 : f32
    %118 = vector.broadcast %cst_51 : f32 to vector<8x64xf32>
    %119 = arith.addf %118, %117 : vector<8x64xf32>
    %120 = arith.mulf %109, %119 : vector<8x64xf32>
    %c0_52 = arith.constant 0 : index
    %c0_53 = arith.constant 0 : index
    %c0_54 = arith.constant 0 : index
    %121 = vector.load %arg14[%c0_52, %c0_53, %c0_54] : memref<1x64x32xbf16, #tpu.memory_space<vmem>>, vector<1x64x32xbf16>
    %122 = vector.shape_cast %121 : vector<1x64x32xbf16> to vector<64x32xbf16>
    %c0_55 = arith.constant 0 : index
    %c0_56 = arith.constant 0 : index
    %c0_57 = arith.constant 0 : index
    %123 = vector.load %arg15[%c0_55, %c0_56, %c0_57] : memref<1x1x32xf32, #tpu.memory_space<vmem>>, vector<1x1x32xf32>
    %124 = vector.shape_cast %123 : vector<1x1x32xf32> to vector<1x32xf32>
    %125 = arith.truncf %120 : vector<8x64xf32> to vector<8x64xbf16>
    %cst_58 = arith.constant dense<0.000000e+00> : vector<8x32xf32>
    %126 = tpu.matmul %125, %122, %cst_58 {dimension_numbers = #tpu.dot_dimension_numbers<[1], [0], [0], [1], [0, 0, 1, 1], [], []>} : vector<8x64xbf16>, vector<64x32xbf16>, vector<8x32xf32> -> vector<8x32xf32>
    %127 = vector.broadcast %124 : vector<1x32xf32> to vector<8x32xf32>
    %128 = arith.addf %126, %127 : vector<8x32xf32>
    %129 = arith.addf %99, %128 : vector<8x32xf32>
    %c0_59 = arith.constant 0 : index
    %c0_60 = arith.constant 0 : index
    %c0_61 = arith.constant 0 : index
    %130 = vector.load %arg16[%c0_59, %c0_60, %c0_61] : memref<1x1x32xf32, #tpu.memory_space<vmem>>, vector<1x1x32xf32>
    %131 = vector.shape_cast %130 : vector<1x1x32xf32> to vector<1x32xf32>
    %c0_62 = arith.constant 0 : index
    %c0_63 = arith.constant 0 : index
    %c0_64 = arith.constant 0 : index
    %132 = vector.load %arg17[%c0_62, %c0_63, %c0_64] : memref<1x1x32xf32, #tpu.memory_space<vmem>>, vector<1x1x32xf32>
    %133 = vector.shape_cast %132 : vector<1x1x32xf32> to vector<1x32xf32>
    %cst_65 = arith.constant dense<0.000000e+00> : vector<8xf32>
    %134 = vector.multi_reduction <add>, %129, %cst_65 [1] : vector<8x32xf32> to vector<8xf32>
    %135 = vector.shape_cast %134 : vector<8xf32> to vector<8x1xf32>
    %cst_66 = arith.constant 3.200000e+01 : f32
    %136 = vector.broadcast %cst_66 : f32 to vector<8x1xf32>
    %137 = arith.divf %135, %136 : vector<8x1xf32>
    %138 = vector.broadcast %137 : vector<8x1xf32> to vector<8x32xf32>
    %139 = arith.subf %129, %138 : vector<8x32xf32>
    %140 = arith.mulf %139, %139 : vector<8x32xf32>
    %cst_67 = arith.constant dense<0.000000e+00> : vector<8xf32>
    %141 = vector.multi_reduction <add>, %140, %cst_67 [1] : vector<8x32xf32> to vector<8xf32>
    %142 = vector.shape_cast %141 : vector<8xf32> to vector<8x1xf32>
    %cst_68 = arith.constant 3.200000e+01 : f32
    %143 = vector.broadcast %cst_68 : f32 to vector<8x1xf32>
    %144 = arith.divf %142, %143 : vector<8x1xf32>
    %cst_69 = arith.constant 9.99999996E-13 : f32
    %145 = vector.broadcast %cst_69 : f32 to vector<8x1xf32>
    %146 = arith.addf %144, %145 : vector<8x1xf32>
    %147 = math.rsqrt %146 : vector<8x1xf32>
    %148 = vector.broadcast %147 : vector<8x1xf32> to vector<8x32xf32>
    %149 = arith.mulf %139, %148 : vector<8x32xf32>
    %150 = vector.broadcast %131 : vector<1x32xf32> to vector<8x32xf32>
    %151 = arith.mulf %149, %150 : vector<8x32xf32>
    %152 = vector.broadcast %133 : vector<1x32xf32> to vector<8x32xf32>
    %153 = arith.addf %151, %152 : vector<8x32xf32>
    %c0_70 = arith.constant 0 : index
    %c0_71 = arith.constant 0 : index
    %154 = vector.load %arg22[%c0_70, %c0_71] : memref<8x32xf32, #tpu.memory_space<vmem>>, vector<8x32xf32>
    tpu.vector_store %arg22[%c0_70, %c0_71], %153 {strides = array<i32>} : memref<8x32xf32, #tpu.memory_space<vmem>>, vector<8x32xf32>,
    %c1_i32 = arith.constant 1 : i32
    %155 = arith.cmpi eq, %arg1, %c1_i32 : i32
    %156 = arith.extui %155 : i1 to i32
    %c0_i32_72 = arith.constant 0 : i32
    %157 = arith.cmpi ne, %156, %c0_i32_72 : i32
    scf.if %157 {
      %158 = vector.extract_strided_slice %153 {offsets = [0, 0], sizes = [1, 32], strides = [1, 1]} : vector<8x32xf32> to vector<1x32xf32>
      %c0_73 = arith.constant 0 : index
      %c0_74 = arith.constant 0 : index
      %c0_75 = arith.constant 0 : index
      %159 = vector.load %arg20[%c0_73, %c0_74, %c0_75] : memref<1x1x32xf32, #tpu.memory_space<vmem>>, vector<1x1x32xf32>
      %160 = vector.shape_cast %159 : vector<1x1x32xf32> to vector<1x32xf32>
      %161 = vector.shape_cast %158 : vector<1x32xf32> to vector<1x1x32xf32>
      tpu.vector_store %arg20[%c0_73, %c0_74, %c0_75], %161 {strides = array<i32>} : memref<1x1x32xf32, #tpu.memory_space<vmem>>, vector<1x1x32xf32>,
      %c0_76 = arith.constant 0 : index
      %c0_77 = arith.constant 0 : index
      %162 = vector.load %arg18[%c0_76, %c0_77] : memref<32x32xbf16, #tpu.memory_space<vmem>>, vector<32x32xbf16>
      %c0_78 = arith.constant 0 : index
      %c0_79 = arith.constant 0 : index
      %163 = vector.load %arg19[%c0_78, %c0_79] : memref<1x32xf32, #tpu.memory_space<vmem>>, vector<1x32xf32>
      %164 = arith.truncf %158 : vector<1x32xf32> to vector<1x32xbf16>
      %cst_80 = arith.constant dense<0.000000e+00> : vector<1x32xf32>
      %165 = tpu.matmul %164, %162, %cst_80 {dimension_numbers = #tpu.dot_dimension_numbers<[1], [0], [0], [1], [0, 0, 1, 1], [], []>} : vector<1x32xbf16>, vector<32x32xbf16>, vector<1x32xf32> -> vector<1x32xf32>
      %166 = arith.addf %165, %163 : vector<1x32xf32>
      %167 = math.tanh %166 : vector<1x32xf32>
      %c0_81 = arith.constant 0 : index
      %c0_82 = arith.constant 0 : index
      %c0_83 = arith.constant 0 : index
      %168 = vector.load %arg21[%c0_81, %c0_82, %c0_83] : memref<1x1x32xf32, #tpu.memory_space<vmem>>, vector<1x1x32xf32>
      %169 = vector.shape_cast %168 : vector<1x1x32xf32> to vector<1x32xf32>
      %170 = vector.shape_cast %167 : vector<1x32xf32> to vector<1x1x32xf32>
      tpu.vector_store %arg21[%c0_81, %c0_82, %c0_83], %170 {strides = array<i32>} : memref<1x1x32xf32, #tpu.memory_space<vmem>>, vector<1x1x32xf32>,
    } else {
    }
    return
  }
  func.func @transform_0(%arg0: i32, %arg1: i32) -> (i32, i32, i32) {
    %c0_i32 = arith.constant 0 : i32
    %c0_i32_0 = arith.constant 0 : i32
    %c0_i32_1 = arith.constant 0 : i32
    return %arg0, %c0_i32, %c0_i32_0 : i32, i32, i32
  }
  func.func @transform_1(%arg0: i32, %arg1: i32) -> (i32, i32, i32) {
    %c0_i32 = arith.constant 0 : i32
    %c0_i32_0 = arith.constant 0 : i32
    %c0_i32_1 = arith.constant 0 : i32
    return %arg0, %c0_i32, %c0_i32_0 : i32, i32, i32
  }
  func.func @transform_2(%arg0: i32, %arg1: i32) -> (i32, i32) {
    %c0_i32 = arith.constant 0 : i32
    %c0_i32_0 = arith.constant 0 : i32
    %c0_i32_1 = arith.constant 0 : i32
    return %c0_i32, %c0_i32_0 : i32, i32
  }
  func.func @transform_3(%arg0: i32, %arg1: i32) -> (i32, i32) {
    %c0_i32 = arith.constant 0 : i32
    %c0_i32_0 = arith.constant 0 : i32
    %c0_i32_1 = arith.constant 0 : i32
    return %c0_i32, %c0_i32_0 : i32, i32
  }
  func.func @transform_4(%arg0: i32, %arg1: i32) -> (i32, i32, i32) {
    %c0_i32 = arith.constant 0 : i32
    %c0_i32_0 = arith.constant 0 : i32
    %c0_i32_1 = arith.constant 0 : i32
    return %arg1, %c0_i32, %c0_i32_0 : i32, i32, i32
  }
  func.func @transform_5(%arg0: i32, %arg1: i32) -> (i32, i32, i32) {
    %c0_i32 = arith.constant 0 : i32
    %c0_i32_0 = arith.constant 0 : i32
    %c0_i32_1 = arith.constant 0 : i32
    return %arg1, %c0_i32, %c0_i32_0 : i32, i32, i32
  }
  func.func @transform_6(%arg0: i32, %arg1: i32) -> (i32, i32, i32) {
    %c0_i32 = arith.constant 0 : i32
    %c0_i32_0 = arith.constant 0 : i32
    %c0_i32_1 = arith.constant 0 : i32
    return %arg1, %c0_i32, %c0_i32_0 : i32, i32, i32
  }
  func.func @transform_7(%arg0: i32, %arg1: i32) -> (i32, i32, i32) {
    %c0_i32 = arith.constant 0 : i32
    %c0_i32_0 = arith.constant 0 : i32
    %c0_i32_1 = arith.constant 0 : i32
    return %arg1, %c0_i32, %c0_i32_0 : i32, i32, i32
  }
  func.func @transform_8(%arg0: i32, %arg1: i32) -> (i32, i32, i32) {
    %c0_i32 = arith.constant 0 : i32
    %c0_i32_0 = arith.constant 0 : i32
    %c0_i32_1 = arith.constant 0 : i32
    return %arg1, %c0_i32, %c0_i32_0 : i32, i32, i32
  }
  func.func @transform_9(%arg0: i32, %arg1: i32) -> (i32, i32, i32) {
    %c0_i32 = arith.constant 0 : i32
    %c0_i32_0 = arith.constant 0 : i32
    %c0_i32_1 = arith.constant 0 : i32
    return %arg1, %c0_i32, %c0_i32_0 : i32, i32, i32
  }
  func.func @transform_10(%arg0: i32, %arg1: i32) -> (i32, i32, i32) {
    %c0_i32 = arith.constant 0 : i32
    %c0_i32_0 = arith.constant 0 : i32
    %c0_i32_1 = arith.constant 0 : i32
    return %arg1, %c0_i32, %c0_i32_0 : i32, i32, i32
  }
  func.func @transform_11(%arg0: i32, %arg1: i32) -> (i32, i32, i32) {
    %c0_i32 = arith.constant 0 : i32
    %c0_i32_0 = arith.constant 0 : i32
    %c0_i32_1 = arith.constant 0 : i32
    return %arg1, %c0_i32, %c0_i32_0 : i32, i32, i32
  }
  func.func @transform_12(%arg0: i32, %arg1: i32) -> (i32, i32, i32) {
    %c0_i32 = arith.constant 0 : i32
    %c0_i32_0 = arith.constant 0 : i32
    %c0_i32_1 = arith.constant 0 : i32
    return %arg1, %c0_i32, %c0_i32_0 : i32, i32, i32
  }
  func.func @transform_13(%arg0: i32, %arg1: i32) -> (i32, i32, i32) {
    %c0_i32 = arith.constant 0 : i32
    %c0_i32_0 = arith.constant 0 : i32
    %c0_i32_1 = arith.constant 0 : i32
    return %arg1, %c0_i32, %c0_i32_0 : i32, i32, i32
  }
  func.func @transform_14(%arg0: i32, %arg1: i32) -> (i32, i32, i32) {
    %c0_i32 = arith.constant 0 : i32
    %c0_i32_0 = arith.constant 0 : i32
    %c0_i32_1 = arith.constant 0 : i32
    return %arg1, %c0_i32, %c0_i32_0 : i32, i32, i32
  }
  func.func @transform_15(%arg0: i32, %arg1: i32) -> (i32, i32, i32) {
    %c0_i32 = arith.constant 0 : i32
    %c0_i32_0 = arith.constant 0 : i32
    %c0_i32_1 = arith.constant 0 : i32
    return %arg1, %c0_i32, %c0_i32_0 : i32, i32, i32
  }
  func.func @transform_16(%arg0: i32, %arg1: i32) -> (i32, i32) {
    %c0_i32 = arith.constant 0 : i32
    %c0_i32_0 = arith.constant 0 : i32
    %c0_i32_1 = arith.constant 0 : i32
    return %c0_i32, %c0_i32_0 : i32, i32
  }
  func.func @transform_17(%arg0: i32, %arg1: i32) -> (i32, i32) {
    %c0_i32 = arith.constant 0 : i32
    %c0_i32_0 = arith.constant 0 : i32
    %c0_i32_1 = arith.constant 0 : i32
    return %c0_i32, %c0_i32_0 : i32, i32
  }
  func.func @transform_18(%arg0: i32, %arg1: i32) -> (i32, i32, i32) {
    %c0_i32 = arith.constant 0 : i32
    %c0_i32_0 = arith.constant 0 : i32
    %c0_i32_1 = arith.constant 0 : i32
    return %arg0, %c0_i32, %c0_i32_0 : i32, i32, i32
  }
  func.func @transform_19(%arg0: i32, %arg1: i32) -> (i32, i32, i32) {
    %c0_i32 = arith.constant 0 : i32
    %c0_i32_0 = arith.constant 0 : i32
    %c0_i32_1 = arith.constant 0 : i32
    return %arg0, %c0_i32, %c0_i32_0 : i32, i32, i32
  }
}

</mosaic_0001>

<bundles_post_ra>
// kernel: simcse_forward.1
= control target key start
LH: loop header
LB: loop body
LE: loop exit
PB: predicated region body
PF: predicated region fallthrough
CT: control target
= control target key end

     0   :  { %s2676_s0 = inlined_call_operand.vmem [shape: f32[2,8,32], index: 0, kind: input, shape index: {}]   ;;  %s2677_s1 = inlined_call_operand.vmem [shape: f32[2,1,8], index: 1, kind: input, shape index: {}]   ;;  %s2678_s2 = inlined_call_operand.vmem [shape: f32[1,32], index: 2, kind: input, shape index: {}]   ;;  %s2679_s3 = inlined_call_operand.vmem [shape: f32[1,32], index: 3, kind: input, shape index: {}]   ;;  %s2680_s4 = inlined_call_operand.vmem [shape: bf16[2,32,96], index: 4, kind: input, shape index: {}]   ;;  %s2681_s5 = inlined_call_operand.vmem [shape: f32[2,1,96], index: 5, kind: input, shape index: {}]   ;;  %s2682_s6 = inlined_call_operand.vmem [shape: bf16[2,32,32], index: 6, kind: input, shape index: {}]   ;;  %s2683_s7 = inlined_call_operand.vmem [shape: f32[2,1,32], index: 7, kind: input, shape index: {}]   ;;  %s2684_s8 = inlined_call_operand.vmem [shape: f32[2,1,32], index: 8, kind: input, shape index: {}]   ;;  %s2685_s9 = inlined_call_operand.vmem [shape: f32[2,1,32], index: 9, kind: input, shape index: {}]   ;;  %s2686_s10 = inlined_call_operand.vmem [shape: bf16[2,32,64], index: 10, kind: input, shape index: {}]   ;;  %s2687_s11 = inlined_call_operand.vmem [shape: f32[2,1,64], index: 11, kind: input, shape index: {}]   ;;  %s2688_s12 = inlined_call_operand.vmem [shape: bf16[2,64,32], index: 12, kind: input, shape index: {}]   ;;  %s2689_s13 = inlined_call_operand.vmem [shape: f32[2,1,32], index: 13, kind: input, shape index: {}]   ;;  %s2690_s14 = inlined_call_operand.vmem [shape: f32[2,1,32], index: 14, kind: input, shape index: {}]   ;;  %s2691_s15 = inlined_call_operand.vmem [shape: f32[2,1,32], index: 15, kind: input, shape index: {}]   ;;  %s2692_s16 = inlined_call_operand.vmem [shape: bf16[32,32], index: 16, kind: input, shape index: {}]   ;;  %s2693_s17 = inlined_call_operand.vmem [shape: f32[1,32], index: 17, kind: input, shape index: {}]   ;;  %s2694_s18 = inlined_call_operand.hbm [shape: f32[2,1,32], index: 18, kind: output, shape index: {0}]   ;;  %s2695_s19 = inlined_call_operand.hbm [shape: f32[2,1,32], index: 19, kind: output, shape index: {1}]  }
   0x1   :  { %2716 = sst [smem:[#allocation24_spill]] %s2676_s0 }
   0x2   :  { %2717 = sst [smem:[#allocation25_spill]] %s2677_s1 }
   0x3   :  { %2718 = sst [smem:[#allocation26_spill]] %s2678_s2 }
   0x4   :  { %2719 = sst [smem:[#allocation27_spill]] %s2679_s3 }
   0x5   :  { %2720 = sst [smem:[#allocation28_spill]] %s2680_s4 }
   0x6   :  { %2721 = sst [smem:[#allocation29_spill]] %s2682_s6 }
   0x7   :  { %2722 = sst [smem:[#allocation30_spill]] %s2692_s16 }
   0x8   :  { %2723 = sst [smem:[#allocation31_spill]] %s2693_s17 }
   0x9   :  { %2724 = sst [smem:[#allocation32_spill]] %s2694_s18 }
   0xa   :  { %2725 = sst [smem:[#allocation33_spill]] %s2695_s19 }
   0xb   :  { %25 = vsyncpa [#allocation4], 0 }
   0xc   :  { %27 = vsyncpa [#allocation4 + $0x1], 0 }
   0xd   :  { %28 = vsyncpa [#allocation6], 0 }
   0xe   :  { %30 = vsyncpa [#allocation6 + $0x1], 0  ;;  %s2327_s0 = smov 0   ;;  %s2329_s30 = smov 0  }
   0xf   :  { %s2331_s20 = smov 0   ;;  %s2333_s21 = smov 0  }
  0x10   :  { %s2335_s1 = smov 0   ;;  %s2337_s22 = smov 0  }
  0x11   :  { %s2339_s2 = smov 0   ;;  %s2341_s23 = smov 0  }
  0x12 LB: > { %2726 = sst [smem:[#allocation9_spill]] %s2186_s0  ;;  %s1822_s24 = sadd.s32 4294967295, %s2214_s23   ;;  %s2214_s23 = sphi %s2341_s23, %s36_s23   ;;  %s2210_s2 = sphi %s2339_s2, %s2779_s2   ;;  %s2206_s22 = sphi %s2337_s22, %s2778_s22   ;;  %s2202_s1 = sphi %s2335_s1, %s2777_s1   ;;  %s2198_s21 = sphi %s2333_s21, %s2776_s21   ;;  %s2194_s20 = sphi %s2331_s20, %s2775_s20   ;;  %s2190_s30 = sphi %s2329_s30, %s2774_s30   ;;  %s2186_s0 = sphi %s2327_s0, %s2773_s0  }
  0x13   : > { %2727 = sst [smem:[#allocation10_spill]] %s2190_s30  ;;  %s1823_s25 = sadd.s32 4294967294, %s2214_s23  }
  0x14   : > { %2728 = sst [smem:[#allocation11_spill]] %s2194_s20  ;;  %s45_s3 = sadd.s32 1, %s2206_s22 }
  0x15   : > { %2729 = sst [smem:[#allocation12_spill]] %s2198_s21  ;;  %p46_p0 = scmp.ge.s32.totalorder %s45_s3, 2 }
  0x16   : > { %2730 = sst [smem:[#allocation13_spill]] %s2202_s1  ;;  %s48_s26 = sadd.s32 1, %s2210_s2 }
  0x17   : > { %2731 = sst [smem:[#allocation14_spill]] %s2206_s22  ;;  %p513_p1 = scmp.ne.s32.totalorder %s2194_s20, %s2190_s30 }
  0x18   : > { %2732 = sst [smem:[#allocation15_spill]] %s2210_s2  ;;  %p514_p2 = scmp.eq.s32.totalorder %s1822_s24, 3 }
  0x19   : > { %2733 = sst [smem:[#allocation16_spill]] %s2214_s23  ;;  %s2781_s3 = smov (%p46_p0, %s45_s3), 0 }
  0x1a   : > { %2734 = sst [smem:[#allocation17_spill]] %s2781_s3  ;;  %s2783_s26 = smov (!%p46_p0, %s48_s26), %s2210_s2 }
  0x1b   : > { %p2376_p3 = por %p514_p2, %p513_p1  ;;  %p519_p4 = scmp.ne.s32.totalorder %s2190_s30, %s2186_s0 }
  0x1c   : > { %p50_p5 = scmp.ge.s32.totalorder %s2783_s26, 2  ;;  %p520_p6 = scmp.eq.s32.totalorder %s1823_s25, 3 }
  0x1d   : > { %s2735_s27 = scalar_select %p2376_p3, 1, 0 }
  0x1e   : > { %p1826_p7 = scmp.ge.s32.totalorder %s2214_s23, 1  ;;  %p669_p8 = scmp.lt.s32.totalorder %s2214_s23, 5 }
  0x1f   : > { %2736 = sst [smem:[#allocation18_spill]] %s2735_s27  ;;  %s2785_s26 = smov (%p50_p5, %s2783_s26), 0 }
  0x20   : > { %2737 = sst [smem:[#allocation19_spill]] %s2785_s26  ;;  %p2386_p9 = por %p520_p6, %p519_p4 }
  0x21   : > { %p670_p10 = pnand %p1826_p7, %p669_p8  ;;  %s500_s29 = ssub.s32 %s2210_s2, %s2785_s26 }
  0x22   : > { %s2738_s28 = scalar_select %p2386_p9, 1, 0 }
  0x23   : > { %s503_s24 = sadd.s32 1, %s2194_s20  ;;  %p501_p11 = scmp.eq.s32.totalorder %s500_s29, 0 }
  0x24   : > { %2739 = sst [smem:[#allocation20_spill]] %s2738_s28  ;;  %673 = sbr.rel (%p670_p10) target bundleno = 2925 (0xb6d), region = 92 }
  0x25   : > { %s2394_s3 = scalar_select %p501_p11, %s2194_s20, %s503_s24  }
  0x27   : > { %2740 = sst [smem:[#allocation21_spill]] %s2394_s3 }
  0x29   : > { %s2397_s25 = sand.u32 1, %s2190_s30   ;;  %p774_p12 = scmp.lt.s32.totalorder %s2202_s1, 1 }
  0x2a   : > { %p781_p13 = scmp.lt.s32.totalorder %s2198_s21, 1  ;;  %s2743_s0 = sld [smem:[#allocation24_spill]] }
  0x2b   : > { %s2401_s22 = scalar_select %p774_p12, %s2202_s1, 1 }
  0x2c   : > { %s2413_s19 = scalar_select %p781_p13, %s2198_s21, 1 }
  0x2d   : > { %2741 = sst [smem:[#allocation22_spill]] %s2401_s22  ;;  %s1827_s28 = sshll.u32 %s2401_s22, 3 }
  0x2e   : > { %s1875_s2 = sshll.u32 %s2413_s19, 4  ;;  %s2744_s4 = sld [smem:[#allocation28_spill]] }
  0x2f   : > { %s2745_s6 = sld [smem:[#allocation29_spill]]  ;;  %s818_s26 = scalar_lea.vmem %s2689_s13, %s2413_s19 }
  0x30   : > { %s777_s23 = scalar_lea.vmem %s2743_s0, %s1827_s28  ;;  %s821_s0 = scalar_lea.vmem %s2690_s14, %s2413_s19 }
  0x31   : > { %s824_s21 = scalar_lea.vmem %s2691_s15, %s2413_s19  ;;  %s767_s30 = scalar_lea.vmem [#allocation3], %s2397_s25 }
  0x32   : > { %s2715_s24 = scalar_lea.vmem [#allocation5], %s2397_s25 }
  0x34   : > { %s2423_s28 = scalar_lea.vmem %s2744_s4, %s1875_s2  ;;  %s2445_s4 = scalar_lea.vmem %s2686_s10, %s1875_s2 }
  0x35   : > { %s2428_s18 = scalar_lea.vmem %s2745_s6, %s1875_s2  ;;  %s2747_s6 = sld [smem:[#allocation12_spill]] }
  0x36   : > { %2746 = sst [smem:[#allocation23_spill]] %s2428_s18  ;;  %s1878_s18 = sshll.u32 %s2413_s19, 5 }
  0x37   : > { %s2455_s17 = scalar_lea.vmem %s2688_s12, %s1878_s18 }
  0x3b   : > { %p1836_p0 = scmp.ne.s32.totalorder %s2747_s6, 0 }
  0x3c   : > { %s2748_s20 = sld [smem:[#allocation26_spill]] (!%p1836_p0) }
  0x3d   : > { %829 = sbr.rel (%p1836_p0) target bundleno = 376 (0x178), region = 96  ;;  %s2749_s27 = sld [smem:[#allocation27_spill]] (!%p1836_p0) }
  0x42   : > { %v830_v0 = vld [vmem:[%s777_s23] sm:$0xff]  ;;  %vm833_vm0 = vcmask 261120  }
  0x43   : > { %v834_v1 = vsel %vm833_vm0, %v830_v0, 0.0  ;;  %v1837_v11 = vld [vmem:[%s2748_s20] ss:$0 sm:$0xff] }
  0x44   : > { %835 = vadd.xlane.f32.xlu0 %v834_v1  ;;  %v1838_v13 = vld [vmem:[%s2749_s27] ss:$0 sm:$0xff] }
  0xcd   : > { %v836_v2 = vpop.xlane.xlu0 %835 }
  0xce   : > { %v838_v3 = vmul.f32 0.03125, %v836_v2 }
  0xd0   : > { %v839_v4 = vsub.f32 %v830_v0, %v838_v3 }
  0xd2   : > { %v840_v5 = vmul.f32 %v839_v4, %v839_v4 }
  0xd4   : > { %v841_v6 = vsel %vm833_vm0, %v840_v5, 0.0 }
  0xd5   : > { %842 = vadd.xlane.f32.xlu0 %v841_v6 }
 0x15e   : > { %v843_v7 = vpop.xlane.xlu0 %842 }
 0x15f   : > { %v844_v8 = vmul.f32 0.03125, %v843_v7 }
 0x161   : > { %v845_v9 = vadd.f32 1e-12, %v844_v8 }
 0x163   : > { %2062 = vrsqrt.f32 %v845_v9 }
 0x170   : > { %v2063_v10 = vpop.eup %2062 }
 0x171   : > { %v847_v12 = vmul.f32 %v2063_v10, %v839_v4 }
 0x173   : > { %v854_v14 = vmul.f32 %v1837_v11, %v847_v12 }
 0x175   : > { %v861_v15 = vadd.f32 %v1838_v13, %v854_v14 }
 0x177   : > { %862 = vst.msk [vmem:[#allocation2] sm:$0xff] %vm833_vm0, %v861_v15 }
 0x178 PF: > { %v2064_v16 = vld [vmem:[%s2423_s28 + $0x8] sm:$0xff]   ;;  %v2216_v17 = vmov 0.0   ;;  %v2065_v18 = vld [vmem:[%s2423_s28] sm:$0xff]   ;;  %vm2217_vm1 = vmmov 0   ;;  %vm888_vm2 = vcmask 261120   ;;  %s2750_s22 = scalar_lea.vmem %s2681_s5, %s2413_s19  ;;  %s2218_s29 = smov 112  }
 0x179   : > { %1905 = vmatprep.subr.bf16.mxu1 %v2216_v17  ;;  %1919 = vmatprep.subr.bf16.mxu0 %v2216_v17  ;;  %v1839_v21 = vld [vmem:[%s2750_s22] ss:$0 sm:$0xff]  ;;  %s2219_s2 = smov 96   ;;  %s2220_s3 = smov 80   ;;  %vm941_vm3 = vcmask 130048   ;;  %vm996_vm4 = vcmask 64512  }
 0x17a   : > { %1906 = vmatpush3.bf16.msra.mxu1 %v2064_v16  ;;  %1909 = vmatprep.mubr.msk.bf16.mxu1 %vm2217_vm1, %v2216_v17  ;;  %s2751_s18 = sld [smem:[#allocation22_spill]]  ;;  %s2221_s27 = smov 64   ;;  %vm1014_vm5 = vcmask 1043456   ;;  %vm1425_vm6 = vcmask 523264  }
 0x17b   : > { %1907 = vmatprep.subr.bf16.mxu1 %v2216_v17  ;;  %1921 = vmatprep.mubr.msk.bf16.mxu0 %vm2217_vm1, %v2216_v17  ;;  %s2752_s23 = sld [smem:[#allocation25_spill]]  ;;  %s2222_s28 = smov 48  }
 0x17c   : > { %s2754_s16 = sld [smem:[#allocation23_spill]]  ;;  %s2756_s6 = scalar_lea.vmem %s2684_s8, %s2413_s19 }
 0x17e   : > { %v2487_v19 = vld [vmem:[#allocation2] sm:$0xff]  ;;  %1908 = vmatpush3.bf16.msra.mxu1 %v2065_v18 }
 0x17f   : > { %v869_v20 = vpack.c.bf16 %v2487_v19, %v2487_v19  ;;  %1913 = vmatprep.subr.bf16.mxu1 %v2216_v17 }
 0x181   : > { %1910 = vmatmul.mubr.msk.bf16.vlgmr.msra.gmra.mxu1 %vm888_vm2, %v869_v20  ;;  %s2753_s1 = scalar_lea.vmem %s2752_s23, %s2751_s18 }
 0x182   : > { %1915 = vmatprep.mubr.msk.bf16.mxu1 %vm2217_vm1, %v2216_v17  ;;  %v1844_v34 = vld [vmem:[%s2753_s1] ss:$0 sm:$0xff]  ;;  %v2067_v7 = vld [vmem:[%s2754_s16 + $0x8] sm:$0xff]  }
 0x183   : > { %v2066_v6 = vld [vmem:[%s2754_s16] sm:$0xff]  }
 0x241   : > { %v926_v22 = vpop.f32.mrf.mxu1 }
 0x242   : > { %v927_v23 = vadd.f32 %v1839_v21, %v926_v22 }
 0x243   : > { %v1911_v24 = vpop.f32.mrf.mxu1 }
 0x244   : > { %v937_v25 = vpack.c.bf16 %v927_v23, %v927_v23 }
 0x245   : > { %v929_v26 = vpop.f32.mrf.mxu1 }
 0x246   : > { %1059 = vrot.lane.b32.xlu1 %v937_v25, %s2218_s29  ;;  %939 = vrot.lane.b32.xlu0 %v937_v25, %s2219_s2  ;;  %s2755_s2 = scalar_lea.vmem %s2683_s7, %s2413_s19 }
 0x247   : > { %v1912_v27 = vpop.f32.mrf.mxu1 }
 0x24a   : > { %1061 = vrot.lane.b32.xlu0 %v937_v25, %s2220_s3  ;;  %s2759_s3 = sld [smem:[#allocation12_spill]] }
 0x250   : > { %p1867_p1 = scmp.ne.s32.totalorder %s2759_s3, 1 }
 0x251   : > { %s2760_s20 = sld [smem:[#allocation30_spill]] (!%p1867_p1) }
 0x252   : > { %s2762_s1 = sld [smem:[#allocation31_spill]] (!%p1867_p1) }
 0x2b8   : > { %v940_v28 = vpop.permute.xlu0 %939  ;;  %v1060_v32 = vpop.permute.xlu1 %1059 }
 0x2b9   : > { %v946_v29 = vsel %vm941_vm3, %v940_v28, 0 }
 0x2ba   : > { %1914 = vmatpush3.bf16.xpose.msra.mxu1 %v946_v29 }
 0x2bb   : > { %1925 = vmatprep.subr.bf16.mxu1 %v2216_v17 }
 0x2bc   : > { %v1062_v30 = vpop.permute.xlu0 %1061 }
 0x2bd   : > { %v1067_v31 = vsel %vm941_vm3, %v1062_v30, 0 }
 0x2c1   : > { %1916 = vmatmul.mubr.msk.bf16.vlgmr.msra.gmra.mxu1 %vm941_vm3, %v937_v25 }
 0x2c2   : > { %1926 = vmatpush3.bf16.xpose.msra.mxu1 %v1067_v31  ;;  %1927 = vmatprep.mubr.msk.bf16.mxu1 %vm2217_vm1, %v2216_v17 }
 0x2c3   : > { %1937 = vmatprep.subr.bf16.mxu1 %v2216_v17 }
 0x2c9   : > { %1928 = vmatmul.mubr.msk.bf16.vlgmr.msra.gmra.mxu1 %vm941_vm3, %v1060_v32 }
 0x2ca   : > { %1939 = vmatprep.mubr.msk.bf16.mxu1 %vm2217_vm1, %v2216_v17  ;;  %1938 = vmatpush3.bf16.msra.mxu1 %v2067_v7 }
 0x2cb   : > { %1949 = vmatprep.subr.bf16.mxu1 %v2216_v17 }
 0x381   : > { %v982_v33 = vpop.f32.mrf.mxu1 }
 0x382   : > { %v988_v35 = vmul.f32 0.25, %v982_v33 }
 0x383   : > { %v1917_v36 = vpop.f32.mrf.mxu1 }
 0x384   : > { %v995_v37 = vadd.f32 %v1844_v34, %v988_v35 }
 0x385   : > { %v985_v38 = vpop.f32.mrf.mxu1 }
 0x386   : > { %v997_v39 = vsel %vm996_vm4, %v995_v37, -inf  ;;  %v2068_v38 = vld [vmem:[%s2445_s4 + $0x8] sm:$0xff]  }
 0x387   : > { %998 = vmax.xlane.f32.xlu1 %v997_v39  ;;  %v1918_v40 = vpop.f32.mrf.mxu1  ;;  %v2069_v39 = vld [vmem:[%s2445_s4] sm:$0xff]   ;;  %s2757_s4 = scalar_lea.vmem %s2685_s9, %s2413_s19 }
 0x389   : > { %v1103_v41 = vpop.f32.mrf.mxu1 }
 0x38a   : > { %v1109_v42 = vmul.f32 0.25, %v1103_v41 }
 0x38b   : > { %v1929_v43 = vpop.f32.mrf.mxu1 }
 0x38c   : > { %v1110_v44 = vadd.f32 %v1844_v34, %v1109_v42  ;;  %v1853_v43 = vld [vmem:[%s2756_s6] ss:$0 sm:$0xff] }
 0x38d   : > { %v1106_v45 = vpop.f32.mrf.mxu1 }
 0x38e   : > { %v1111_v46 = vsel %vm996_vm4, %v1110_v44, -inf  ;;  %v1854_v45 = vld [vmem:[%s2757_s4] ss:$0 sm:$0xff]  ;;  %s2761_s4 = smov (!%p1867_p1), %s2760_s20 }
 0x38f   : > { %1112 = vmax.xlane.f32.xlu0 %v1111_v46  ;;  %v1930_v47 = vpop.f32.mrf.mxu1 }
 0x410   : > { %v999_v48 = vpop.xlane.xlu1 %998 }
 0x411   : > { %v1000_v49 = vsub.f32 %v995_v37, %v999_v48 }
 0x413   : > { %v1001_v50 = vmul.f32 1.442695, %v1000_v49  ;;  %v2070_v49 = vld [vmem:[%s2455_s17 + $0x18] sm:$0xff]  }
 0x415   : > { %2074 = vpow2.f32 %v1001_v50  ;;  %v2071_v50 = vld [vmem:[%s2455_s17 + $0x10] sm:$0xff]  }
 0x418   : > { %v1113_v51 = vpop.xlane.xlu0 %1112 }
 0x419   : > { %v1114_v52 = vsub.f32 %v1110_v44, %v1113_v51  ;;  %v2072_v51 = vld [vmem:[%s2455_s17 + $0x8] sm:$0xff]  }
 0x41b   : > { %v1115_v53 = vmul.f32 1.442695, %v1114_v52  ;;  %v2073_v52 = vld [vmem:[%s2455_s17] sm:$0xff]  }
 0x41d   : > { %2076 = vpow2.f32 %v1115_v53 }
 0x422   : > { %v2075_v54 = vpop.eup %2074 }
 0x423   : > { %v1003_v55 = vsel %vm996_vm4, %v2075_v54, 0.0 }
 0x424   : > { %1004 = vadd.xlane.f32.xlu0 %v1003_v55 }
 0x42a   : > { %v2077_v56 = vpop.eup %2076 }
 0x42b   : > { %v1117_v57 = vsel %vm996_vm4, %v2077_v56, 0.0 }
 0x42c   : > { %1118 = vadd.xlane.f32.xlu1 %v1117_v57 }
 0x43a   : > { %1009 = vrot.lane.b32.xlu0 %v937_v25, %s2221_s27 }
 0x43d   : > { %1123 = vrot.lane.b32.xlu1 %v937_v25, %s2222_s28  ;;  %v1852_v25 = vld [vmem:[%s2755_s2] ss:$0 sm:$0xff]  ;;  %s2758_s28 = scalar_lea.vmem %s2687_s11, %s2413_s19 }
 0x43e   : > { %v1855_v53 = vld [vmem:[%s2758_s28] ss:$0 sm:$0xff] }
 0x4ad   : > { %v1005_v58 = vpop.xlane.xlu0 %1004 }
 0x4ae   : > { %2078 = vrcp.f32 %v1005_v58 }
 0x4b1   : > { %v1010_v59 = vpop.permute.xlu0 %1009 }
 0x4b2   : > { %v1016_v60 = vsel %vm1014_vm5, %v1010_v59, 0 }
 0x4b3   : > { %1920 = vmatpush3.bf16.msra.mxu0 %v1016_v60 }
 0x4b4   : > { %1931 = vmatprep.subr.bf16.mxu0 %v2216_v17 }
 0x4b5   : > { %v1119_v61 = vpop.xlane.xlu1 %1118 }
 0x4b6   : > { %2080 = vrcp.f32 %v1119_v61 }
 0x4b9   : > { %v1124_v0 = vpop.permute.xlu1 %1123 }
 0x4ba   : > { %v1129_v2 = vsel %vm1014_vm5, %v1124_v0, 0 }
 0x4bb   : > { %v2079_v62 = vpop.eup %2078 }
 0x4bc   : > { %v1007_v63 = vmul.f32 %v2079_v62, %v2075_v54 }
 0x4be   : > { %v1008_v1 = vpack.c.bf16 %v1007_v63, %v1007_v63 }
 0x4c0   : > { %1922 = vmatmul.mubr.msk.bf16.vlgmr.msra.gmra.mxu0 %vm996_vm4, %v1008_v1 }
 0x4c1   : > { %1932 = vmatpush3.bf16.msra.mxu0 %v1129_v2  ;;  %1933 = vmatprep.mubr.msk.bf16.mxu0 %vm2217_vm1, %v2216_v17 }
 0x4c2   : > { %1943 = vmatprep.subr.bf16.mxu0 %v2216_v17 }
 0x4c3   : > { %v2081_v3 = vpop.eup %2080 }
 0x4c4   : > { %v1121_v4 = vmul.f32 %v2081_v3, %v2077_v56 }
 0x4c6   : > { %v1122_v5 = vpack.c.bf16 %v1121_v4, %v1121_v4  ;;  %v1859_v4 = vld [vmem:[%s818_s26] ss:$0 sm:$0xff] }
 0x4c8   : > { %1934 = vmatmul.mubr.msk.bf16.vlgmr.msra.gmra.mxu0 %vm996_vm4, %v1122_v5 }
 0x4c9   : > { %1945 = vmatprep.mubr.msk.bf16.mxu0 %vm2217_vm1, %v2216_v17  ;;  %1944 = vmatpush3.bf16.msra.mxu0 %v2066_v6 }
 0x4ca   : > { %1957 = vmatprep.subr.bf16.mxu0 %v2216_v17 }
 0x580   : > { %v1052_v8 = vpop.f32.mrf.mxu0 }
 0x581   : > { %v1058_v9 = vpack.c.bf16 %v1052_v8, %v1052_v8 }
 0x582   : > { %v1923_v10 = vpop.f32.mrf.mxu0 }
 0x583   : > { %1946 = vmatmul.mubr.msk.bf16.vlgmr.msra.gmra.mxu0 %vm941_vm3, %v1058_v9 }
 0x584   : > { %v1055_v11 = vpop.f32.mrf.mxu0  ;;  %1965 = vmatprep.mubr.msk.bf16.mxu0 %vm2217_vm1, %v2216_v17  ;;  %1958 = vmatpush3.bf16.msra.mxu0 %v2070_v49 }
 0x585   : > { %1959 = vmatprep.subr.bf16.mxu0 %v2216_v17 }
 0x586   : > { %v1924_v12 = vpop.f32.mrf.mxu0 }
 0x588   : > { %v1165_v13 = vpop.f32.mrf.mxu0  ;;  %1960 = vmatpush3.bf16.msra.mxu0 %v2071_v50 }
 0x589   : > { %v1171_v14 = vpack.c.bf16 %v1165_v13, %v1165_v13  ;;  %1961 = vmatprep.subr.bf16.mxu0 %v2216_v17 }
 0x58a   : > { %v1935_v15 = vpop.f32.mrf.mxu0 }
 0x58b   : > { %1940 = vmatmul.mubr.msk.bf16.vlgmr.msra.gmra.mxu1 %vm941_vm3, %v1171_v14 }
 0x58c   : > { %v1168_v16 = vpop.f32.mrf.mxu0  ;;  %1953 = vmatprep.mubr.msk.bf16.mxu1 %vm2217_vm1, %v2216_v17  ;;  %1950 = vmatpush3.bf16.msra.mxu1 %v2068_v38 }
 0x58d   : > { %1951 = vmatprep.subr.bf16.mxu1 %v2216_v17  ;;  %1962 = vmatpush3.bf16.msra.mxu0 %v2072_v51 }
 0x58e   : > { %v1936_v18 = vpop.f32.mrf.mxu0  ;;  %1963 = vmatprep.subr.bf16.mxu0 %v2216_v17 }
 0x590   : > { %1952 = vmatpush3.bf16.msra.mxu1 %v2069_v39 }
 0x591   : > { %1964 = vmatpush3.bf16.msra.mxu0 %v2073_v52 }
 0x643   : > { %v1264_v20 = vpop.f32.mrf.mxu0 }
 0x645   : > { %v1947_v21 = vpop.f32.mrf.mxu0 }
 0x647   : > { %v1267_v22 = vpop.f32.mrf.mxu0 }
 0x649   : > { %v1948_v23 = vpop.f32.mrf.mxu0 }
 0x64a   : > { %v1865_v23 = vld [vmem:[%s821_s0] ss:$0 sm:$0xff] }
 0x64b   : > { %v1215_v24 = vpop.f32.mrf.mxu1 }
 0x64c   : > { %v1265_v26 = vadd.f32 %v1264_v20, %v1215_v24 }
 0x64d   : > { %v1941_v27 = vpop.f32.mrf.mxu1 }
 0x64e   : > { %v1277_v28 = vadd.f32 %v1852_v25, %v1265_v26  ;;  %v1866_v25 = vld [vmem:[%s824_s21] ss:$0 sm:$0xff] }
 0x64f   : > { %v1218_v29 = vpop.f32.mrf.mxu1 }
 0x650   : > { %v1278_v30 = vadd.f32 %v1277_v28, %v2487_v19 }
 0x651   : > { %v1942_v31 = vpop.f32.mrf.mxu1 }
 0x652   : > { %v1281_v32 = vsel %vm888_vm2, %v1278_v30, 0.0 }
 0x653   : > { %1282 = vadd.xlane.f32.xlu1 %v1281_v32 }
 0x6dc   : > { %v1283_v33 = vpop.xlane.xlu1 %1282 }
 0x6dd   : > { %v1285_v34 = vmul.f32 0.03125, %v1283_v33 }
 0x6df   : > { %v1286_v35 = vsub.f32 %v1278_v30, %v1285_v34 }
 0x6e1   : > { %v1287_v36 = vmul.f32 %v1286_v35, %v1286_v35 }
 0x6e3   : > { %v1288_v37 = vsel %vm888_vm2, %v1287_v36, 0.0 }
 0x6e4   : > { %1289 = vadd.xlane.f32.xlu0 %v1288_v37 }
 0x76d   : > { %v1290_v19 = vpop.xlane.xlu0 %1289 }
 0x76e   : > { %v1291_v40 = vmul.f32 0.03125, %v1290_v19 }
 0x770   : > { %v1292_v41 = vadd.f32 1e-12, %v1291_v40 }
 0x772   : > { %2082 = vrsqrt.f32 %v1292_v41 }
 0x77f   : > { %v2083_v42 = vpop.eup %2082 }
 0x780   : > { %v1294_v44 = vmul.f32 %v2083_v42, %v1286_v35 }
 0x782   : > { %v1301_v46 = vmul.f32 %v1853_v43, %v1294_v44 }
 0x784   : > { %v1308_v47 = vadd.f32 %v1854_v45, %v1301_v46 }
 0x786   : > { %v1314_v48 = vpack.c.bf16 %v1308_v47, %v1308_v47 }
 0x788   : > { %1954 = vmatmul.mubr.msk.bf16.vlgmr.msra.gmra.mxu1 %vm888_vm2, %v1314_v48 }
 0x848   : > { %v1370_v54 = vpop.f32.mrf.mxu1 }
 0x849   : > { %v1371_v55 = vadd.f32 %v1855_v53, %v1370_v54 }
 0x84a   : > { %v1955_v56 = vpop.f32.mrf.mxu1 }
 0x84b   : > { %v1377_v57 = vmul.f32 0.044715, %v1371_v55  ;;  %v1376_v17 = vmul.f32 0.5, %v1371_v55 }
 0x84c   : > { %v1373_v58 = vpop.f32.mrf.mxu1 }
 0x84d   : > { %v1378_v59 = vmul.f32 %v1377_v57, %v1371_v55 }
 0x84e   : > { %v1956_v60 = vpop.f32.mrf.mxu1 }
 0x84f   : > { %v1379_v61 = vmul.f32 %v1378_v59, %v1371_v55 }
 0x851   : > { %v1380_v62 = vadd.f32 %v1379_v61, %v1371_v55 }
 0x853   : > { %v1381_v63 = vmul.f32 0.7978846, %v1380_v62 }
 0x855   : > { %2084 = vtanh.f32 %v1381_v63 }
 0x862   : > { %v2085_v0 = vpop.eup %2084 }
 0x863   : > { %v1383_v1 = vadd.f32 1.0, %v2085_v0 }
 0x865   : > { %v1384_v2 = vmul.f32 %v1383_v1, %v1376_v17 }
 0x867   : > { %v1394_v3 = vpack.c.bf16 %v1384_v2, %v1384_v2 }
 0x869   : > { %1966 = vmatmul.mubr.msk.bf16.vlgmr.msra.gmra.mxu0 %vm1425_vm6, %v1394_v3 }
 0x929   : > { %v1463_v5 = vpop.f32.mrf.mxu0 }
 0x92a   : > { %v1464_v6 = vadd.f32 %v1859_v4, %v1463_v5 }
 0x92b   : > { %v1967_v7 = vpop.f32.mrf.mxu0 }
 0x92c   : > { %v1469_v8 = vadd.f32 %v1464_v6, %v1308_v47 }
 0x92d   : > { %v1466_v9 = vpop.f32.mrf.mxu0 }
 0x92e   : > { %v1472_v10 = vsel %vm888_vm2, %v1469_v8, 0.0 }
 0x92f   : > { %1473 = vadd.xlane.f32.xlu0 %v1472_v10  ;;  %v1968_v11 = vpop.f32.mrf.mxu0 }
 0x9b8   : > { %v1474_v12 = vpop.xlane.xlu0 %1473 }
 0x9b9   : > { %v1475_v13 = vmul.f32 0.03125, %v1474_v12 }
 0x9bb   : > { %v1476_v14 = vsub.f32 %v1469_v8, %v1475_v13 }
 0x9bd   : > { %v1477_v15 = vmul.f32 %v1476_v14, %v1476_v14 }
 0x9bf   : > { %v1478_v16 = vsel %vm888_vm2, %v1477_v15, 0.0 }
 0x9c0   : > { %1479 = vadd.xlane.f32.xlu1 %v1478_v16 }
 0xa49   : > { %v1480_v18 = vpop.xlane.xlu1 %1479 }
 0xa4a   : > { %v1481_v20 = vmul.f32 0.03125, %v1480_v18 }
 0xa4c   : > { %v1482_v21 = vadd.f32 1e-12, %v1481_v20 }
 0xa4e   : > { %2086 = vrsqrt.f32 %v1482_v21 }
 0xa5b   : > { %v2087_v22 = vpop.eup %2086 }
 0xa5c   : > { %v1484_v24 = vmul.f32 %v2087_v22, %v1476_v14 }
 0xa5e   : > { %v1491_v26 = vmul.f32 %v1865_v23, %v1484_v24  ;;  %1503 = sbr.rel (%p1867_p1) target bundleno = 2878 (0xb3e), region = 100 }
 0xa60   : > { %v1498_v27 = vadd.f32 %v1866_v25, %v1491_v26 }
 0xa62   : > { %1499 = vst.msk [vmem:[#allocation2] sm:$0xff] %vm888_vm2, %v1498_v27 }
 0xa63   : > { %v2088_v28 = vld [vmem:[%s2760_s20 + $0x8] sm:$0xff]   ;;  %v2223_v29 = vmov 0.0   ;;  %v2089_v30 = vld [vmem:[%s2761_s4] sm:$0xff]   ;;  %vm2224_vm7 = vmmov 0   ;;  %vm1504_vm8 = vcmask 253952   ;;  %v1511_v31 = vpack.c.bf16 %v1498_v27, %v1498_v27 }
 0xa64   : > { %1969 = vmatprep.subr.bf16.mxu0 %v2223_v29  ;;  %1973 = vmatprep.mubr.msk.bf16.mxu0 %vm2224_vm7, %v2223_v29  ;;  %1505 = vst.msk [vmem:[%s767_s30] sm:$0x1] %vm1504_vm8, %v1498_v27  ;;  %v1510_v32 = vld [vmem:[%s2762_s1] sm:$0x1] }
 0xa65   : > { %1970 = vmatpush3.bf16.msra.mxu0 %v2088_v28 }
 0xa66   : > { %1971 = vmatprep.subr.bf16.mxu0 %v2223_v29 }
 0xa69   : > { %1972 = vmatpush3.bf16.msra.mxu0 %v2089_v30 }
 0xa6c   : > { %1974 = vmatmul.mubr.msk.bf16.vlgmr.msra.gmra.mxu0 %vm888_vm2, %v1511_v31 }
 0xb2c   : > { %v1561_v33 = vpop.f32.mrf.mxu0 }
 0xb2d   : > { %v1562_v34 = vadd.f32 %v1561_v33, %v1510_v32 }
 0xb2e   : > { %v1975_v35 = vpop.f32.mrf.mxu0 }
 0xb2f   : > { %2090 = vtanh.f32 %v1562_v34 }
 0xb30   : > { %v1564_v36 = vpop.f32.mrf.mxu0 }
 0xb32   : > { %v1976_v37 = vpop.f32.mrf.mxu0 }
 0xb3c   : > { %v2091_v38 = vpop.eup %2090 }
 0xb3d   : > { %1568 = vst.msk [vmem:[%s2715_s24] sm:$0x1] %vm1504_vm8, %v2091_v38 }
 0xb3e PF: > { %s2763_s27 = sld [smem:[#allocation13_spill]]  ;;  %s1586_s3 = sshll.u32 %s767_s30, 4  ;;  %s1587_s3 = int_to_ptr.vmem [resolvable:$true] %s1586_s3 }
 0xb3f   : > { %s2765_s22 = sld [smem:[#allocation32_spill]]  ;;  %s1570_s18 = scalar_lea.sflag [#allocation4], %s2397_s25 }
 0xb40   : > { %s2092_s6 = scalar_lea.vmem %s1587_s3, 16  ;;  %s2225_s20 = smov [#allocation3]  }
 0xb41   : > { %p2093_p2 = scmp.ne.s32.totalorder %s1587_s3, %s2092_s6  ;;  %s2096_s0 = sshll.u32 %s2225_s20, 4  ;;  %s2097_s0 = int_to_ptr.vmem [resolvable:$false] %s2096_s0 }
 0xb42   : > { %s2098_s23 = scalar_lea.vmem %s2097_s0, 32  ;;  %p2099_p6 = scmp.lt.s32.totalorder %s1587_s3, %s2097_s0 }
 0xb43   : > { %p2094_p4 = pnand %p2093_p2, %p2376_p3  ;;  %p2100_p7 = scmp.lt.s32.totalorder %s2098_s23, %s2092_s6 }
 0xb44   : > { %s1871_s17 = sshll.u32 %s2763_s27, 4 }
 0xb45   : > { %s2766_s29 = smov %s2765_s22  ;;  %s1584_s2 = scalar_lea.hbm %s2765_s22, %s1871_s17 }
 0xb46   : > { %p2095_p5 = pneg %p2094_p4  ;;  %p2101_p8 = por %p2100_p7, %p2099_p6 }
 0xb48   : > { %p2102_p10 = pnand %p2101_p8, %p2095_p5 }
 0xb4a   : > { %2105 = shalt.err (!%p2102_p10)
}
 0xb4b   : > { %s2106_s19 = scalar_lea.hbm %s1584_s2, 16  ;;  %s2110_s1 = scalar_lea.hbm %s2766_s29, 32 }
 0xb4c   : > { %p2107_p11 = scmp.ne.s32.totalorder %s1584_s2, %s2106_s19  ;;  %p2111_p0 = scmp.lt.s32.totalorder %s1584_s2, %s2766_s29 }
 0xb4d   : > { %p2112_p1 = scmp.lt.s32.totalorder %s2110_s1, %s2106_s19 }
 0xb4e   : > { %p2108_p12 = pnand %p2107_p11, %p2376_p3 }
 0xb4f   : > { %p2113_p2 = por %p2112_p1, %p2111_p0 }
 0xb50   : > { %p2109_p13 = pneg %p2108_p12 }
 0xb52   : > { %p2114_p4 = pnand %p2113_p2, %p2109_p13 }
 0xb54   : > { %2117 = shalt.err (!%p2114_p4)
}
 0xb55   : > { %1977 = dma.vmem_to_hbm [thread:$0]  (%p2376_p3), %s1587_s3, 16, %s1584_s2, %s1570_s18  }
 0xb56   : > { %s2767_s20 = sld [smem:[#allocation33_spill]]  ;;  %s2769_s23 = scalar_lea.vmem [#allocation5], %s2397_s25 }
 0xb57   : > { %s1599_s30 = sshll.u32 %s2769_s23, 4  ;;  %s1574_s21 = scalar_lea.sflag [#allocation6], %s2397_s25  ;;  %s1600_s30 = int_to_ptr.vmem [resolvable:$true] %s1599_s30 }
 0xb58   : > { %s2118_s19 = scalar_lea.vmem %s1600_s30, 16  ;;  %s2226_s1 = smov [#allocation5]  }
 0xb59   : > { %p2119_p5 = scmp.ne.s32.totalorder %s1600_s30, %s2118_s19  ;;  %s2122_s16 = sshll.u32 %s2226_s1, 4  ;;  %s2123_s16 = int_to_ptr.vmem [resolvable:$false] %s2122_s16 }
 0xb5a   : > { %s2124_s26 = scalar_lea.vmem %s2123_s16, 32  ;;  %p2125_p8 = scmp.lt.s32.totalorder %s1600_s30, %s2123_s16 }
 0xb5b   : > { %p2120_p6 = pnand %p2119_p5, %p2376_p3  ;;  %p2126_p10 = scmp.lt.s32.totalorder %s2124_s26, %s2118_s19 }
 0xb5c   : > { %s2768_s24 = smov %s2767_s20  ;;  %s1597_s0 = scalar_lea.hbm %s2767_s20, %s1871_s17 }
 0xb5d   : > { %p2121_p7 = pneg %p2120_p6  ;;  %p2127_p11 = por %p2126_p10, %p2125_p8 }
 0xb5f   : > { %p2128_p12 = pnand %p2127_p11, %p2121_p7 }
 0xb61   : > { %2131 = shalt.err (!%p2128_p12)
}
 0xb62   : > { %s2132_s27 = scalar_lea.hbm %s1597_s0, 16  ;;  %s2136_s2 = scalar_lea.hbm %s2768_s24, 32 }
 0xb63   : > { %p2133_p13 = scmp.ne.s32.totalorder %s1597_s0, %s2132_s27  ;;  %p2137_p2 = scmp.lt.s32.totalorder %s1597_s0, %s2768_s24 }
 0xb64   : > { %p2138_p4 = scmp.lt.s32.totalorder %s2136_s2, %s2132_s27 }
 0xb65   : > { %p2134_p0 = pnand %p2133_p13, %p2376_p3 }
 0xb66   : > { %p2139_p5 = por %p2138_p4, %p2137_p2 }
 0xb67   : > { %p2135_p1 = pneg %p2134_p0 }
 0xb69   : > { %p2140_p6 = pnand %p2139_p5, %p2135_p1 }
 0xb6b   : > { %2143 = shalt.err (!%p2140_p6)
}
 0xb6c   : > { %1978 = dma.vmem_to_hbm [thread:$0]  (%p2376_p3), %s1600_s30, 16, %s1597_s0, %s1574_s21  }
 0xb6d PF: > { %s2770_s22 = sld [smem:[#allocation16_spill]] }
 0xb6e   : > { %s2771_s6 = sld [smem:[#allocation9_spill]] }
 0xb73   : > { %p1988_p7 = scmp.ge.s32.totalorder %s2770_s22, 2 }
 0xb74   : > { %s1611_s23 = sand.u32 1, %s2771_s6  }
 0xb75   : > { %p1982_p8 = pnand %p1988_p7, %p2386_p9  ;;  %s1612_s19 = scalar_lea.sflag [#allocation4], %s1611_s23 }
 0xb77   : > { %p1983_p10 = pneg %p1982_p8 }
 0xb79   : > { %2177 = dma.done.wait (%p1983_p10), %s1612_s19, 16  }
 0xb7a   : > { %2179 = vsyncadd (%p1983_p10), %s1612_s19, 4294967280  ;;  %s1620_s1 = scalar_lea.sflag [#allocation6], %s1611_s23 }
 0xb7b   : > { %2181 = dma.done.wait (%p1983_p10), %s1620_s1, 16  }
 0xb7c   : > { %2183 = vsyncadd (%p1983_p10), %s1620_s1, 4294967280  ;;  %s36_s23 = sadd.s32 1, %s2770_s22   ;;  %s2773_s0 = sld [smem:[#allocation10_spill]] }
 0xb7d   : > { %p33_p11 = scmp.ge.s32.totalorder %s36_s23, 6   ;;  %s2774_s30 = sld [smem:[#allocation11_spill]] }
 0xb7e   : > { %s2775_s20 = sld [smem:[#allocation21_spill]] }
 0xb7f   : > { %s2776_s21 = sld [smem:[#allocation14_spill]]  ;;  %35 = sbr.rel (!%p33_p11) target bundleno = 18 (0x12), region = 191 }
 0xb80   : > { %s2777_s1 = sld [smem:[#allocation15_spill]] }
 0xb81   : > { %s2778_s22 = sld [smem:[#allocation17_spill]] }
 0xb82   : > { %s2779_s2 = sld [smem:[#allocation19_spill]] }
 0xb84   :  { %1624 = vsyncpa [#allocation4], 1 }
 0xb85   :  { %1626 = vsyncpa [#allocation4 + $0x1], 1 }
 0xb86   :  { %1627 = vsyncpa [#allocation6], 1 }
 0xb87   :  { %1629 = vsyncpa [#allocation6 + $0x1], 1 }

</bundles_post_ra>
